<compile_context>
chip_gen: v5e
topology: v5e:2x2
jax: 0.10.0
libtpu: 0.0.40
codegen_flags: <defaults>
</compile_context>

<pallas_src>
import jax
import jax.numpy as jnp
from jax.experimental import pallas as pl
from jax.experimental.pallas import tpu as pltpu


def conv3x3_relu_kernel(w_ref, p_ref, o_ref):
    # w_ref: (Cout, 9*Cin)    bf16 -- fused conv weights, one row per output channel
    # p_ref: (9*Cin, N*H*W)   bf16 -- im2col patches for the whole batch (lane-dense)
    # o_ref: (Cout, N*H*W)    f32  -- lane-dense output slab (N*H*W multiple of 128)
    acc = jnp.dot(w_ref[...], p_ref[...], preferred_element_type=jnp.float32)
    o_ref[...] = jnp.maximum(acc, 0.0).astype(o_ref.dtype)  # fused ReLU


@jax.jit
def conv_relu_resnet(x_nchw, w_oihw):
    """Forward pass equivalent to ConvRelu_ResNet: relu(conv2d(x, w, pad=1, bias=False))."""
    N, Cin, H, W = x_nchw.shape
    Cout = w_oihw.shape[0]
    K = 9 * Cin
    NHW = N * H * W

    # ---- wrapper glue (XLA): zero-pad + im2col, channel-first, batch folded into lanes.
    x_pad = jnp.pad(x_nchw, ((0, 0), (0, 0), (1, 1), (1, 1)))  # (N, Cin, H+2, W+2)
    # taps[n, (ky*3+kx)*Cin + ci, h, w] = x_pad[n, ci, h+ky, w+kx]
    taps = jnp.concatenate(
        [x_pad[:, :, ky:ky + H, kx:kx + W] for ky in range(3) for kx in range(3)],
        axis=1,
    )
    # patches[(ky*3+kx)*Cin + ci, n*H*W + h*W + w]
    patches = jnp.transpose(taps.reshape(N, K, H * W), (1, 0, 2)).reshape(K, NHW)
    # w_mat[co, (ky*3+kx)*Cin + ci] = w_oihw[co, ci, ky, kx]
    w_mat = jnp.transpose(w_oihw, (0, 2, 3, 1)).reshape(Cout, K)

    # bf16 operands (half the HBM->VMEM traffic, bf16-native MXU); f32 accumulation in-kernel.
    patches = patches.astype(jnp.bfloat16)
    w_mat = w_mat.astype(jnp.bfloat16)

    out = pl.pallas_call(
        conv3x3_relu_kernel,
        out_shape=jax.ShapeDtypeStruct((Cout, NHW), x_nchw.dtype),
        grid=(1,),  # single fused matmul: one grid step, one MXU fill/drain
        in_specs=[
            pl.BlockSpec((Cout, K), lambda i: (0, 0)),
            pl.BlockSpec((K, NHW), lambda i: (0, 0)),
        ],
        out_specs=pl.BlockSpec((Cout, NHW), lambda i: (0, 0)),
        compiler_params=pltpu.CompilerParams(
            dimension_semantics=("arbitrary",),
        ),
    )(w_mat, patches)

    # (Cout, N*H*W) -> (N, Cout, H, W): cheap (~72 KiB) wrapper-side transpose.
    return jnp.transpose(out.reshape(Cout, N, H, W), (1, 0, 2, 3))


if __name__ == "__main__":
    # Shapes consistent with the module: ConvRelu_ResNet(num_in=4, num_out=8)
    N, Cin, Cout, H, W = 2, 4, 8, 16, 16

    key = jax.random.PRNGKey(0)
    kx, kw = jax.random.split(key)
    x = jax.random.normal(kx, (N, Cin, H, W), dtype=jnp.float32)
    # Deterministic Kaiming-like init for the 3x3 conv weight (OIHW), no bias.
    fan_in = Cin * 3 * 3
    w = jax.random.normal(kw, (Cout, Cin, 3, 3), dtype=jnp.float32) * (2.0 / fan_in) ** 0.5

    out = conv_relu_resnet(x, w)
    out = jax.block_until_ready(out)
    assert out.shape == (N, Cout, H, W)

    def conv(xa, wa):
        return jax.lax.conv_general_dilated(
            xa, wa, window_strides=(1, 1), padding=((1, 1), (1, 1)),
            dimension_numbers=("NCHW", "OIHW", "NCHW"),
            preferred_element_type=jnp.float32,
        )

    # Tight check vs a reference using the SAME bf16-rounded operands:
    # catches any layout / tap-ordering bug without being masked by cast error.
    ref_bf16 = jnp.maximum(conv(x.astype(jnp.bfloat16), w.astype(jnp.bfloat16)), 0.0)
    assert jnp.allclose(out, ref_bf16.astype(out.dtype), rtol=1e-4, atol=1e-4), \
        "mismatch vs bf16-operand reference conv"

    # Loose check vs the exact f32 module semantics (difference = bf16 operand rounding only).
    ref_f32 = jnp.maximum(conv(x, w), 0.0)
    assert jnp.allclose(out, ref_f32, rtol=2e-2, atol=2e-2), "mismatch vs f32 reference conv"

    print("KERNEL_OK")
</pallas_src>

<mosaic_0001>
module attributes {stable_mosaic.version = 11 : i64} {
  func.func @conv3x3_relu_kernel(%arg0: i32, %arg1: memref<8x36xbf16, #tpu.memory_space<vmem>>, %arg2: memref<36x512xbf16, #tpu.memory_space<vmem>>, %arg3: memref<8x512xf32, #tpu.memory_space<vmem>>) attributes {dimension_semantics = [#tpu.dimension_semantics<arbitrary>], iteration_bounds = array<i64: 1>, scalar_prefetch = 0 : i64, scratch_operands = 0 : i64, tpu.core_type = #tpu.core_type<tc>, window_params = [{pipeline_mode = #tpu.pipeline_mode<synchronous>, transform_indices = @transform_0, window_bounds = array<i64: 8, 36>}, {pipeline_mode = #tpu.pipeline_mode<synchronous>, transform_indices = @transform_1, window_bounds = array<i64: 36, 512>}, {pipeline_mode = #tpu.pipeline_mode<synchronous>, transform_indices = @transform_2, window_bounds = array<i64: 8, 512>}]} {
    %c0 = arith.constant 0 : index
    %c0_0 = arith.constant 0 : index
    %0 = vector.load %arg1[%c0, %c0_0] : memref<8x36xbf16, #tpu.memory_space<vmem>>, vector<8x36xbf16>
    %c0_1 = arith.constant 0 : index
    %c0_2 = arith.constant 0 : index
    %1 = vector.load %arg2[%c0_1, %c0_2] : memref<36x512xbf16, #tpu.memory_space<vmem>>, vector<36x512xbf16>
    %cst = arith.constant dense<0.000000e+00> : vector<8x512xf32>
    %2 = tpu.matmul %0, %1, %cst {dimension_numbers = #tpu.dot_dimension_numbers<[1], [0], [0], [1], [0, 0, 1, 1], [], []>} : vector<8x36xbf16>, vector<36x512xbf16>, vector<8x512xf32> -> vector<8x512xf32>
    %cst_3 = arith.constant 0.000000e+00 : f32
    %3 = vector.broadcast %cst_3 : f32 to vector<8x512xf32>
    %4 = arith.maximumf %2, %3 : vector<8x512xf32>
    %c0_4 = arith.constant 0 : index
    %c0_5 = arith.constant 0 : index
    %5 = vector.load %arg3[%c0_4, %c0_5] : memref<8x512xf32, #tpu.memory_space<vmem>>, vector<8x512xf32>
    tpu.vector_store %arg3[%c0_4, %c0_5], %4 {strides = array<i32>} : memref<8x512xf32, #tpu.memory_space<vmem>>, vector<8x512xf32>,
    return
  }
  func.func @transform_0(%arg0: i32) -> (i32, i32) {
    %c0_i32 = arith.constant 0 : i32
    %c0_i32_0 = arith.constant 0 : i32
    %c0_i32_1 = arith.constant 0 : i32
    return %c0_i32, %c0_i32_0 : i32, i32
  }
  func.func @transform_1(%arg0: i32) -> (i32, i32) {
    %c0_i32 = arith.constant 0 : i32
    %c0_i32_0 = arith.constant 0 : i32
    %c0_i32_1 = arith.constant 0 : i32
    return %c0_i32, %c0_i32_0 : i32, i32
  }
  func.func @transform_2(%arg0: i32) -> (i32, i32) {
    %c0_i32 = arith.constant 0 : i32
    %c0_i32_0 = arith.constant 0 : i32
    %c0_i32_1 = arith.constant 0 : i32
    return %c0_i32, %c0_i32_0 : i32, i32
  }
}

</mosaic_0001>

<bundles_post_ra>
// kernel: conv_relu_resnet.1
= control target key start
LH: loop header
LB: loop body
LE: loop exit
PB: predicated region body
PF: predicated region fallthrough
CT: control target
= control target key end

     0   :  { %vm77_vm0 = vcmask 1041408   ;;  %vm73_vm1 = vcmask 293888   ;;  %s286_s1 = inlined_call_operand.vmem [shape: bf16[36,512], index: 1, kind: input, shape index: {}]   ;;  %s287_s0 = inlined_call_operand.vmem [shape: bf16[8,36], index: 0, kind: input, shape index: {}]   ;;  %s288_s2 = inlined_call_operand.vmem [shape: f32[8,512], index: 2, kind: output, shape index: {}]  }
   0x1   :  { %v21_v0 = vld [vmem:[%s286_s1 + $0x40] sm:$0x33]  ;;  %v22_v1 = vld [vmem:[%s286_s1 + $0x48] sm:$0x33]  ;;  %v196_v7 = vld [vmem:[%s286_s1 + $0x2c] sm:$0xf0] }
   0x2   :  { %v49_v2 = vunpack.c.l.b16 %v21_v0  ;;  %v50_v3 = vunpack.c.h.b16 %v21_v0  ;;  %v51_v4 = vunpack.c.l.b16 %v22_v1  ;;  %v52_v5 = vunpack.c.h.b16 %v22_v1  ;;  %v172_v6 = vld [vmem:[%s286_s1 + $0x20] sm:$0xf]  ;;  %v194_v12 = vld [vmem:[%s286_s1 + $0x24] sm:$0xf]  ;;  %v174_v13 = vld [vmem:[%s286_s1 + $0x30] sm:$0xf0] }
   0x3   :  { %v180_v14 = vld [vmem:[%s286_s1 + $0x28] sm:$0xf]  ;;  %v197_v15 = vld [vmem:[%s286_s1 + $0x34] sm:$0xf0]  ;;  %v195_v16 = vld [vmem:[%s286_s1 + $0x2c] sm:$0xf]  ;;  %v173_v22 = vor.u32 %v196_v7, %v172_v6  ;;  %v177_v23 = vor.u32 %v194_v12, %v174_v13 }
   0x4   :  { %v61_v8 = vpack.c.b16 %v49_v2, %v49_v2  ;;  %v62_v9 = vpack.c.b16 %v50_v3, %v50_v3  ;;  %v63_v10 = vpack.c.b16 %v51_v4, %v51_v4  ;;  %v64_v11 = vpack.c.b16 %v52_v5, %v52_v5  ;;  %v182_v17 = vld [vmem:[%s286_s1 + $0x38] sm:$0xf0]  ;;  %v156_v24 = vld [vmem:[%s286_s1] sm:$0xf]  ;;  %v192_v25 = vld [vmem:[%s286_s1 + $0xc] sm:$0xf0] }
   0x5   :  { %v181_v26 = vor.u32 %v197_v15, %v180_v14  ;;  %v185_v27 = vor.u32 %v195_v16, %v182_v17  ;;  %v190_v28 = vld [vmem:[%s286_s1 + $0x4] sm:$0xf]  ;;  %v158_v29 = vld [vmem:[%s286_s1 + $0x10] sm:$0xf0]  ;;  %v164_v30 = vld [vmem:[%s286_s1 + $0x8] sm:$0xf]  ;;  %v157_v34 = vor.u32 %v192_v25, %v156_v24 }
   0x6   :  { %v79_v18 = vsel %vm77_vm0, %v61_v8, 0  ;;  %v82_v19 = vsel %vm77_vm0, %v62_v9, 0  ;;  %v85_v20 = vsel %vm77_vm0, %v63_v10, 0  ;;  %v88_v21 = vsel %vm77_vm0, %v64_v11, 0  ;;  %v193_v31 = vld [vmem:[%s286_s1 + $0x14] sm:$0xf0] }
   0x7   :  { %95 = vmatpush.bf16.msra.mxu0 %v79_v18  ;;  %108 = vmatpush.bf16.msra.mxu1 %v82_v19  ;;  %v191_v32 = vld [vmem:[%s286_s1 + $0xc] sm:$0xf]  ;;  %v166_v33 = vld [vmem:[%s286_s1 + $0x18] sm:$0xf0]  ;;  %v161_v35 = vor.u32 %v190_v28, %v158_v29  ;;  %v165_v36 = vor.u32 %v193_v31, %v164_v30  ;;  %v12_v38 = vld [vmem:[%s287_s0] sm:$0xf] }
   0x8   :  { %121 = vmatpush.bf16.msra.mxu2 %v85_v20  ;;  %134 = vmatpush.bf16.msra.mxu3 %v88_v21  ;;  %v169_v37 = vor.u32 %v191_v32, %v166_v33 }
   0xb   :  { %96 = vmatpush.bf16.msra.mxu0 %v173_v22  ;;  %109 = vmatpush.bf16.msra.mxu1 %v177_v23 }
   0xc   :  { %122 = vmatpush.bf16.msra.mxu2 %v181_v26  ;;  %135 = vmatpush.bf16.msra.mxu3 %v185_v27 }
   0xf   :  { %97 = vmatpush.bf16.msra.mxu0 %v157_v34  ;;  %110 = vmatpush.bf16.msra.mxu1 %v161_v35 }
  0x10   :  { %123 = vmatpush.bf16.msra.mxu2 %v165_v36  ;;  %136 = vmatpush.bf16.msra.mxu3 %v169_v37 }
  0x12   :  { %186 = vmatmul.msk.bf16.vlgmr.msra.gmra.mxu0 %vm73_vm1, %v12_v38  ;;  %187 = vmatmul.msk.bf16.vlgmr.msra.gmra.mxu1 %vm73_vm1, %v12_v38 }
  0x13   :  { %188 = vmatmul.msk.bf16.vlgmr.msra.gmra.mxu2 %vm73_vm1, %v12_v38  ;;  %189 = vmatmul.msk.bf16.vlgmr.msra.gmra.mxu3 %vm73_vm1, %v12_v38 }
  0x8f   :  { %v99_v39 = vpop.f32.mrf.mxu0  ;;  %v112_v40 = vpop.f32.mrf.mxu1 }
  0x90   :  { %v142_v41 = vmax.f32 %v99_v39, 0.0  ;;  %v143_v42 = vmax.f32 %v112_v40, 0.0 }
  0x92   :  { %146 = vst [vmem:[%s288_s2] sm:$0xff] %v142_v41 }
  0x93   :  { %147 = vst [vmem:[%s288_s2 + $0x8] sm:$0xff] %v143_v42 }
  0x96   :  { %v125_v43 = vpop.f32.mrf.mxu2  ;;  %v138_v44 = vpop.f32.mrf.mxu3 }
  0x97   :  { %v144_v45 = vmax.f32 %v125_v43, 0.0  ;;  %v145_v46 = vmax.f32 %v138_v44, 0.0  ;;  %v101_v47 = vpop.f32.mrf.mxu0  ;;  %v114_v48 = vpop.f32.mrf.mxu1 }
  0x99   :  { %148 = vst [vmem:[%s288_s2 + $0x10] sm:$0xff] %v144_v45 }
  0x9a   :  { %149 = vst [vmem:[%s288_s2 + $0x18] sm:$0xff] %v145_v46 }
  0x9e   :  { %v127_v49 = vpop.f32.mrf.mxu2  ;;  %v140_v50 = vpop.f32.mrf.mxu3 }

</bundles_post_ra>
